<compile_context>
chip_gen: v7x
topology: tpu7x:2x2x1
jax: 0.10.0
libtpu: 0.0.40
codegen_flags: <defaults>
</compile_context>

<pallas_src>
import jax
import jax.numpy as jnp
from jax import lax
from jax.experimental import pallas as pl
from jax.experimental.pallas import tpu as pltpu

# ---------------------------------------------------------------------------
# Dimensions
# ---------------------------------------------------------------------------
B = 8                       # batch
Z_DIM = 32                  # G.z_dim
C_DIM = 32                  # condition (sentence embedding) dim
IMG_C, IMG_H, IMG_W = 3, 16, 16
IMG_FLAT = IMG_C * IMG_H * IMG_W   # 768 = 6 * 128 (lane friendly)
FEAT_DIM = 128              # discriminator feature dim
LANE = 128                  # lane-dense loss output width


# ---------------------------------------------------------------------------
# In-kernel helpers
# ---------------------------------------------------------------------------
def _leaky_relu(x):
    # leaky_relu(x, 0.2) == max(x, 0.2*x): 2 VALU ops (mul + max), no select.
    return jnp.maximum(x, 0.2 * x)


def _c_logits(feat, c, wcf_row, wcc_row, bc):
    # C(feat, c) = feat @ wc_f + c @ wc_c + bc with the N=1 contractions done as
    # VPU multiply + lane reduction (weights stored as (1, D) rows, no MXU pass).
    feat_dot = jnp.sum(feat * wcf_row, axis=-1, keepdims=True)     # (B, 1)
    c_dot = jnp.sum(c * wcc_row, axis=-1, keepdims=True)           # (B, 1)
    return feat_dot + c_dot + bc                                   # (B, 1)


def _lane_pack(l0, l1, l2, l3):
    # Pack four scalar losses into a lane-dense (1, 128) vector: lane i <- l_i.
    lane = lax.broadcasted_iota(jnp.int32, (1, LANE), 1)
    return jnp.where(lane == 0, l0,
           jnp.where(lane == 1, l1,
           jnp.where(lane == 2, l2,
           jnp.where(lane == 3, l3, 0.0))))


# ---------------------------------------------------------------------------
# One fused kernel: G -> D(gen | real) -> C -> four hinge losses
# ---------------------------------------------------------------------------
def _dfgan_fused_kernel(z_ref, c_ref, real_ref,
                        wgz_ref, wgc_ref, bg_ref,
                        wd_ref, bd_ref,
                        wcf_ref, wcc_ref, bc_ref,
                        out_ref):
    b = z_ref.shape[0]
    inv_b = 1.0 / b
    c = c_ref[...]                                                 # (B, C_DIM) f32

    # G: tanh(z @ Wg_z + c @ Wg_c + bg)   (bf16 MXU operands, f32 accumulation)
    pre = (jnp.dot(z_ref[...].astype(jnp.bfloat16), wgz_ref[...],
                   preferred_element_type=jnp.float32)
           + jnp.dot(c.astype(jnp.bfloat16), wgc_ref[...],
                     preferred_element_type=jnp.float32)
           + bg_ref[...])
    gen_img = jnp.tanh(pre)                                        # (B, IMG_FLAT) f32

    # D over the stacked [gen; real] batch; concat happens in bf16 (half the bytes).
    imgs = jnp.concatenate(
        [gen_img.astype(jnp.bfloat16), real_ref[...].astype(jnp.bfloat16)], axis=0)
    feat = _leaky_relu(
        jnp.dot(imgs, wd_ref[...], preferred_element_type=jnp.float32)
        + bd_ref[...])                                             # (2B, FEAT) f32
    gen_feat = feat[:b]
    real_feat = feat[b:]

    wcf = wcf_ref[...]
    wcc = wcc_ref[...]
    bc = bc_ref[...]

    # Mismatched-pair condition built in-kernel on the XLU (c_mis[j] = c[(j-1)%B]).
    c_mis = pltpu.roll(c, shift=1, axis=0)

    gen_logits = _c_logits(gen_feat, c, wcf, wcc, bc)              # (B, 1)
    real_logits = _c_logits(real_feat, c, wcf, wcc, bc)            # (B, 1)
    mis_logits = _c_logits(real_feat, c_mis, wcf, wcc, bc)         # (B, 1)

    g_loss = -jnp.sum(gen_logits) * inv_b
    d_loss_gen = jnp.sum(jnp.maximum(1.0 + gen_logits, 0.0)) * inv_b
    d_loss_real = jnp.sum(jnp.maximum(1.0 - real_logits, 0.0)) * inv_b
    d_loss_mis = jnp.sum(jnp.maximum(1.0 + mis_logits, 0.0)) * inv_b

    out_ref[...] = _lane_pack(g_loss, d_loss_gen, d_loss_real, d_loss_mis)


# ---------------------------------------------------------------------------
# pallas_call plumbing: no grid, everything resident in VMEM, (1, 128) output
# ---------------------------------------------------------------------------
def _vmem():
    return pl.BlockSpec(memory_space=pltpu.MemorySpace.VMEM)


def _fused_losses_call(z, c, real_flat, p):
    return pl.pallas_call(
        _dfgan_fused_kernel,
        out_shape=jax.ShapeDtypeStruct((1, LANE), jnp.float32),
        in_specs=[_vmem() for _ in range(11)],
        out_specs=_vmem(),
    )(z, c, real_flat,
      p["wg_z"], p["wg_c"], p["bg"],
      p["wd"], p["bd"],
      p["wcf"], p["wcc"], p["bc"])


@jax.jit
def _dfgan_losses(params, key, c, real_images):
    # One jitted step = one Python dispatch: z sampling + flatten + kernel + slicing.
    # TODO(synk): z could be generated on-chip (pltpu.prng_seed + stateful_normal) to
    # drop the jax.random.normal op, but the stream would not match jax.random.
    b = real_images.shape[0]
    z = jax.random.normal(key, (b, Z_DIM), jnp.float32)
    real_flat = real_images.reshape(b, -1)                         # NCHW row-major flatten
    out = _fused_losses_call(z, c, real_flat, params)
    return out[0, 0], out[0, 1], out[0, 2], out[0, 3]


# ---------------------------------------------------------------------------
# D_reg: gradient penalty via plain-JAX autodiff of the same D/C math
# (no custom VJP is registered for the fused Pallas forward).
# ---------------------------------------------------------------------------
@jax.jit
def _d_reg_loss(params, real_images, c):
    def loss_sum(img, cc):
        img_flat = img.reshape(img.shape[0], -1)
        feat = _leaky_relu(img_flat @ params["wd"].astype(jnp.float32) + params["bd"])
        logits = (jnp.sum(feat * params["wcf"], axis=-1, keepdims=True)
                  + jnp.sum(cc * params["wcc"], axis=-1, keepdims=True)
                  + params["bc"])
        return jnp.sum(logits)

    g_img, g_c = jax.grad(loss_sum, argnums=(0, 1))(real_images, c)
    b = real_images.shape[0]
    grad = jnp.concatenate([g_img.reshape(b, -1), g_c.reshape(b, -1)], axis=1)
    grad_l2norm = jnp.sqrt(jnp.sum(grad ** 2, axis=1))
    return 2.0 * jnp.mean(grad_l2norm ** 6)


# ---------------------------------------------------------------------------
# DFGAN module
# ---------------------------------------------------------------------------
class DFGANPallas:
    def __init__(self, params):
        self.params = params
        self.z_dim = Z_DIM

    def losses(self, real_images, c, key):
        """Fused path: all four losses from a single kernel launch."""
        return _dfgan_losses(self.params, key, c, real_images)

    def __call__(self, real_images, c, mode, key=None):
        assert mode in ["G_main", "D_main", "D_reg"]
        if mode == "G_main":
            g_loss, _, _, _ = _dfgan_losses(self.params, key, c, real_images)
            return g_loss
        elif mode == "D_main":
            _, d_gen, d_real, d_mis = _dfgan_losses(self.params, key, c, real_images)
            return (d_gen, d_real, d_mis)
        else:  # D_reg
            return _d_reg_loss(self.params, real_images, c)


# ---------------------------------------------------------------------------
# Deterministic parameter init (weights pre-packed for the fused kernel)
# ---------------------------------------------------------------------------
def init_params(key):
    ks = jax.random.split(key, 5)
    s = 0.05
    wg_z = jax.random.normal(ks[0], (Z_DIM, IMG_FLAT), jnp.float32) * s
    wg_c = jax.random.normal(ks[1], (C_DIM, IMG_FLAT), jnp.float32) * s
    wd = jax.random.normal(ks[2], (IMG_FLAT, FEAT_DIM), jnp.float32) * s
    wc_f = jax.random.normal(ks[3], (FEAT_DIM, 1), jnp.float32) * s
    wc_c = jax.random.normal(ks[4], (C_DIM, 1), jnp.float32) * s
    return {
        # Generator weights kept split so the kernel never needs a [z|c] concat;
        # stored bf16 for the MXU.
        "wg_z": wg_z.astype(jnp.bfloat16),                              # (Z, IMG_FLAT)
        "wg_c": wg_c.astype(jnp.bfloat16),                              # (C, IMG_FLAT)
        "bg": jnp.zeros((1, IMG_FLAT), jnp.float32),
        "wd": wd.astype(jnp.bfloat16),                                  # (IMG_FLAT, FEAT)
        "bd": jnp.zeros((1, FEAT_DIM), jnp.float32),
        # Classifier weights stored as rows for the VPU multiply + lane-reduce path.
        "wcf": wc_f.T,                                                  # (1, FEAT_DIM) f32
        "wcc": wc_c.T,                                                  # (1, C_DIM) f32
        "bc": jnp.zeros((1, 1), jnp.float32),
    }


if __name__ == "__main__":
    root = jax.random.PRNGKey(0)
    k_params, k_img, k_c, k_z = jax.random.split(root, 4)

    params = init_params(k_params)
    model = DFGANPallas(params)

    real_images = jax.random.normal(k_img, (B, IMG_C, IMG_H, IMG_W), jnp.float32)
    c = jax.random.normal(k_c, (B, C_DIM), jnp.float32)

    # Fused training-step path: one kernel launch, all four losses.
    all_losses = model.losses(real_images, c, k_z)

    # Per-mode interface of the original module (shares the same compiled kernel).
    g_loss = model(real_images, c, "G_main", k_z)
    d_losses = model(real_images, c, "D_main", k_z)
    gp_loss = model(real_images, c, "D_reg")

    jax.block_until_ready(all_losses)
    jax.block_until_ready(g_loss)
    jax.block_until_ready(d_losses)
    jax.block_until_ready(gp_loss)

    print("KERNEL_OK")
</pallas_src>

<mosaic_0001>
module attributes {stable_mosaic.version = 11 : i64} {
  func.func @_dfgan_fused_kernel(%arg0: memref<8x32xf32, #tpu.memory_space<vmem>>, %arg1: memref<8x32xf32, #tpu.memory_space<vmem>>, %arg2: memref<8x768xf32, #tpu.memory_space<vmem>>, %arg3: memref<32x768xbf16, #tpu.memory_space<vmem>>, %arg4: memref<32x768xbf16, #tpu.memory_space<vmem>>, %arg5: memref<1x768xf32, #tpu.memory_space<vmem>>, %arg6: memref<768x128xbf16, #tpu.memory_space<vmem>>, %arg7: memref<1x128xf32, #tpu.memory_space<vmem>>, %arg8: memref<1x128xf32, #tpu.memory_space<vmem>>, %arg9: memref<1x32xf32, #tpu.memory_space<vmem>>, %arg10: memref<1x1xf32, #tpu.memory_space<vmem>>, %arg11: memref<1x128xf32, #tpu.memory_space<vmem>>) attributes {dimension_semantics = [], scalar_prefetch = 0 : i64, scratch_operands = 0 : i64, tpu.core_type = #tpu.core_type<tc>} {
    %c0 = arith.constant 0 : index
    %c0_0 = arith.constant 0 : index
    %0 = vector.load %arg1[%c0, %c0_0] : memref<8x32xf32, #tpu.memory_space<vmem>>, vector<8x32xf32>
    %c0_1 = arith.constant 0 : index
    %c0_2 = arith.constant 0 : index
    %1 = vector.load %arg0[%c0_1, %c0_2] : memref<8x32xf32, #tpu.memory_space<vmem>>, vector<8x32xf32>
    %2 = arith.truncf %1 : vector<8x32xf32> to vector<8x32xbf16>
    %c0_3 = arith.constant 0 : index
    %c0_4 = arith.constant 0 : index
    %3 = vector.load %arg3[%c0_3, %c0_4] : memref<32x768xbf16, #tpu.memory_space<vmem>>, vector<32x768xbf16>
    %cst = arith.constant dense<0.000000e+00> : vector<8x768xf32>
    %4 = tpu.matmul %2, %3, %cst {dimension_numbers = #tpu.dot_dimension_numbers<[1], [0], [0], [1], [0, 0, 1, 1], [], []>} : vector<8x32xbf16>, vector<32x768xbf16>, vector<8x768xf32> -> vector<8x768xf32>
    %5 = arith.truncf %0 : vector<8x32xf32> to vector<8x32xbf16>
    %c0_5 = arith.constant 0 : index
    %c0_6 = arith.constant 0 : index
    %6 = vector.load %arg4[%c0_5, %c0_6] : memref<32x768xbf16, #tpu.memory_space<vmem>>, vector<32x768xbf16>
    %cst_7 = arith.constant dense<0.000000e+00> : vector<8x768xf32>
    %7 = tpu.matmul %5, %6, %cst_7 {dimension_numbers = #tpu.dot_dimension_numbers<[1], [0], [0], [1], [0, 0, 1, 1], [], []>} : vector<8x32xbf16>, vector<32x768xbf16>, vector<8x768xf32> -> vector<8x768xf32>
    %8 = arith.addf %4, %7 : vector<8x768xf32>
    %c0_8 = arith.constant 0 : index
    %c0_9 = arith.constant 0 : index
    %9 = vector.load %arg5[%c0_8, %c0_9] : memref<1x768xf32, #tpu.memory_space<vmem>>, vector<1x768xf32>
    %10 = vector.broadcast %9 : vector<1x768xf32> to vector<8x768xf32>
    %11 = arith.addf %8, %10 : vector<8x768xf32>
    %12 = math.tanh %11 : vector<8x768xf32>
    %13 = arith.truncf %12 : vector<8x768xf32> to vector<8x768xbf16>
    %c0_10 = arith.constant 0 : index
    %c0_11 = arith.constant 0 : index
    %14 = vector.load %arg2[%c0_10, %c0_11] : memref<8x768xf32, #tpu.memory_space<vmem>>, vector<8x768xf32>
    %15 = arith.truncf %14 : vector<8x768xf32> to vector<8x768xbf16>
    %16 = tpu.concatenate %13, %15 in 0 : vector<8x768xbf16>, vector<8x768xbf16> -> vector<16x768xbf16>
    %c0_12 = arith.constant 0 : index
    %c0_13 = arith.constant 0 : index
    %17 = vector.load %arg6[%c0_12, %c0_13] : memref<768x128xbf16, #tpu.memory_space<vmem>>, vector<768x128xbf16>
    %cst_14 = arith.constant dense<0.000000e+00> : vector<16x128xf32>
    %18 = tpu.matmul %16, %17, %cst_14 {dimension_numbers = #tpu.dot_dimension_numbers<[1], [0], [0], [1], [0, 0, 1, 1], [], []>} : vector<16x768xbf16>, vector<768x128xbf16>, vector<16x128xf32> -> vector<16x128xf32>
    %c0_15 = arith.constant 0 : index
    %c0_16 = arith.constant 0 : index
    %19 = vector.load %arg7[%c0_15, %c0_16] : memref<1x128xf32, #tpu.memory_space<vmem>>, vector<1x128xf32>
    %20 = vector.broadcast %19 : vector<1x128xf32> to vector<16x128xf32>
    %21 = arith.addf %18, %20 : vector<16x128xf32>
    %cst_17 = arith.constant 2.000000e-01 : f32
    %22 = vector.broadcast %cst_17 : f32 to vector<16x128xf32>
    %23 = arith.mulf %22, %21 : vector<16x128xf32>
    %24 = arith.maximumf %21, %23 : vector<16x128xf32>
    %25 = vector.extract_strided_slice %24 {offsets = [0, 0], sizes = [8, 128], strides = [1, 1]} : vector<16x128xf32> to vector<8x128xf32>
    %26 = vector.extract_strided_slice %24 {offsets = [8, 0], sizes = [8, 128], strides = [1, 1]} : vector<16x128xf32> to vector<8x128xf32>
    %c0_18 = arith.constant 0 : index
    %c0_19 = arith.constant 0 : index
    %27 = vector.load %arg8[%c0_18, %c0_19] : memref<1x128xf32, #tpu.memory_space<vmem>>, vector<1x128xf32>
    %c0_20 = arith.constant 0 : index
    %c0_21 = arith.constant 0 : index
    %28 = vector.load %arg9[%c0_20, %c0_21] : memref<1x32xf32, #tpu.memory_space<vmem>>, vector<1x32xf32>
    %c0_22 = arith.constant 0 : index
    %c0_23 = arith.constant 0 : index
    %29 = vector.load %arg10[%c0_22, %c0_23] : memref<1x1xf32, #tpu.memory_space<vmem>>, vector<1x1xf32>
    %c1_i32 = arith.constant 1 : i32
    %30 = tpu.dynamic_rotate %0 by %c1_i32 dim 0 : vector<8x32xf32>, i32 -> vector<8x32xf32>
    %31 = vector.broadcast %27 : vector<1x128xf32> to vector<8x128xf32>
    %32 = arith.mulf %25, %31 : vector<8x128xf32>
    %cst_24 = arith.constant dense<0.000000e+00> : vector<8xf32>
    %33 = vector.multi_reduction <add>, %32, %cst_24 [1] : vector<8x128xf32> to vector<8xf32>
    %34 = vector.shape_cast %33 : vector<8xf32> to vector<8x1xf32>
    %35 = vector.broadcast %28 : vector<1x32xf32> to vector<8x32xf32>
    %36 = arith.mulf %0, %35 : vector<8x32xf32>
    %cst_25 = arith.constant dense<0.000000e+00> : vector<8xf32>
    %37 = vector.multi_reduction <add>, %36, %cst_25 [1] : vector<8x32xf32> to vector<8xf32>
    %38 = vector.shape_cast %37 : vector<8xf32> to vector<8x1xf32>
    %39 = arith.addf %34, %38 : vector<8x1xf32>
    %40 = vector.broadcast %29 : vector<1x1xf32> to vector<8x1xf32>
    %41 = arith.addf %39, %40 : vector<8x1xf32>
    %42 = vector.broadcast %27 : vector<1x128xf32> to vector<8x128xf32>
    %43 = arith.mulf %26, %42 : vector<8x128xf32>
    %cst_26 = arith.constant dense<0.000000e+00> : vector<8xf32>
    %44 = vector.multi_reduction <add>, %43, %cst_26 [1] : vector<8x128xf32> to vector<8xf32>
    %45 = vector.shape_cast %44 : vector<8xf32> to vector<8x1xf32>
    %46 = vector.broadcast %28 : vector<1x32xf32> to vector<8x32xf32>
    %47 = arith.mulf %0, %46 : vector<8x32xf32>
    %cst_27 = arith.constant dense<0.000000e+00> : vector<8xf32>
    %48 = vector.multi_reduction <add>, %47, %cst_27 [1] : vector<8x32xf32> to vector<8xf32>
    %49 = vector.shape_cast %48 : vector<8xf32> to vector<8x1xf32>
    %50 = arith.addf %45, %49 : vector<8x1xf32>
    %51 = vector.broadcast %29 : vector<1x1xf32> to vector<8x1xf32>
    %52 = arith.addf %50, %51 : vector<8x1xf32>
    %53 = vector.broadcast %27 : vector<1x128xf32> to vector<8x128xf32>
    %54 = arith.mulf %26, %53 : vector<8x128xf32>
    %cst_28 = arith.constant dense<0.000000e+00> : vector<8xf32>
    %55 = vector.multi_reduction <add>, %54, %cst_28 [1] : vector<8x128xf32> to vector<8xf32>
    %56 = vector.shape_cast %55 : vector<8xf32> to vector<8x1xf32>
    %57 = vector.broadcast %28 : vector<1x32xf32> to vector<8x32xf32>
    %58 = arith.mulf %30, %57 : vector<8x32xf32>
    %cst_29 = arith.constant dense<0.000000e+00> : vector<8xf32>
    %59 = vector.multi_reduction <add>, %58, %cst_29 [1] : vector<8x32xf32> to vector<8xf32>
    %60 = vector.shape_cast %59 : vector<8xf32> to vector<8x1xf32>
    %61 = arith.addf %56, %60 : vector<8x1xf32>
    %62 = vector.broadcast %29 : vector<1x1xf32> to vector<8x1xf32>
    %63 = arith.addf %61, %62 : vector<8x1xf32>
    %64 = vector.shape_cast %41 : vector<8x1xf32> to vector<1x8x1xf32>
    %cst_30 = arith.constant dense<0.000000e+00> : vector<1xf32>
    %65 = vector.multi_reduction <add>, %64, %cst_30 [1, 2] : vector<1x8x1xf32> to vector<1xf32>
    %66 = vector.shape_cast %65 : vector<1xf32> to vector<1x1x1xf32>
    %67 = vector.extract %66[0, 0, 0] : f32 from vector<1x1x1xf32>
    %cst_31 = arith.constant 0.000000e+00 : f32
    %68 = arith.subf %cst_31, %67 : f32
    %cst_32 = arith.constant 1.250000e-01 : f32
    %69 = arith.mulf %68, %cst_32 : f32
    %cst_33 = arith.constant 1.000000e+00 : f32
    %70 = vector.broadcast %cst_33 : f32 to vector<8x1xf32>
    %71 = arith.addf %70, %41 : vector<8x1xf32>
    %cst_34 = arith.constant 0.000000e+00 : f32
    %72 = vector.broadcast %cst_34 : f32 to vector<8x1xf32>
    %73 = arith.maximumf %71, %72 : vector<8x1xf32>
    %74 = vector.shape_cast %73 : vector<8x1xf32> to vector<1x8x1xf32>
    %cst_35 = arith.constant dense<0.000000e+00> : vector<1xf32>
    %75 = vector.multi_reduction <add>, %74, %cst_35 [1, 2] : vector<1x8x1xf32> to vector<1xf32>
    %76 = vector.shape_cast %75 : vector<1xf32> to vector<1x1x1xf32>
    %77 = vector.extract %76[0, 0, 0] : f32 from vector<1x1x1xf32>
    %cst_36 = arith.constant 1.250000e-01 : f32
    %78 = arith.mulf %77, %cst_36 : f32
    %cst_37 = arith.constant 1.000000e+00 : f32
    %79 = vector.broadcast %cst_37 : f32 to vector<8x1xf32>
    %80 = arith.subf %79, %52 : vector<8x1xf32>
    %cst_38 = arith.constant 0.000000e+00 : f32
    %81 = vector.broadcast %cst_38 : f32 to vector<8x1xf32>
    %82 = arith.maximumf %80, %81 : vector<8x1xf32>
    %83 = vector.shape_cast %82 : vector<8x1xf32> to vector<1x8x1xf32>
    %cst_39 = arith.constant dense<0.000000e+00> : vector<1xf32>
    %84 = vector.multi_reduction <add>, %83, %cst_39 [1, 2] : vector<1x8x1xf32> to vector<1xf32>
    %85 = vector.shape_cast %84 : vector<1xf32> to vector<1x1x1xf32>
    %86 = vector.extract %85[0, 0, 0] : f32 from vector<1x1x1xf32>
    %cst_40 = arith.constant 1.250000e-01 : f32
    %87 = arith.mulf %86, %cst_40 : f32
    %cst_41 = arith.constant 1.000000e+00 : f32
    %88 = vector.broadcast %cst_41 : f32 to vector<8x1xf32>
    %89 = arith.addf %88, %63 : vector<8x1xf32>
    %cst_42 = arith.constant 0.000000e+00 : f32
    %90 = vector.broadcast %cst_42 : f32 to vector<8x1xf32>
    %91 = arith.maximumf %89, %90 : vector<8x1xf32>
    %92 = vector.shape_cast %91 : vector<8x1xf32> to vector<1x8x1xf32>
    %cst_43 = arith.constant dense<0.000000e+00> : vector<1xf32>
    %93 = vector.multi_reduction <add>, %92, %cst_43 [1, 2] : vector<1x8x1xf32> to vector<1xf32>
    %94 = vector.shape_cast %93 : vector<1xf32> to vector<1x1x1xf32>
    %95 = vector.extract %94[0, 0, 0] : f32 from vector<1x1x1xf32>
    %cst_44 = arith.constant 1.250000e-01 : f32
    %96 = arith.mulf %95, %cst_44 : f32
    %97 = tpu.iota {dimensions = array<i32: 1>} : vector<1x128xi32>
    %c0_i32 = arith.constant 0 : i32
    %98 = vector.broadcast %c0_i32 : i32 to vector<1x128xi32>
    %99 = arith.cmpi eq, %97, %98 : vector<1x128xi32>
    %c1_i32_45 = arith.constant 1 : i32
    %100 = vector.broadcast %c1_i32_45 : i32 to vector<1x128xi32>
    %101 = arith.cmpi eq, %97, %100 : vector<1x128xi32>
    %c2_i32 = arith.constant 2 : i32
    %102 = vector.broadcast %c2_i32 : i32 to vector<1x128xi32>
    %103 = arith.cmpi eq, %97, %102 : vector<1x128xi32>
    %c3_i32 = arith.constant 3 : i32
    %104 = vector.broadcast %c3_i32 : i32 to vector<1x128xi32>
    %105 = arith.cmpi eq, %97, %104 : vector<1x128xi32>
    %cst_46 = arith.constant 0.000000e+00 : f32
    %106 = vector.broadcast %96 : f32 to vector<1x128xf32>
    %107 = vector.broadcast %cst_46 : f32 to vector<1x128xf32>
    %108 = arith.select %105, %106, %107 : vector<1x128xi1>, vector<1x128xf32>
    %109 = vector.broadcast %87 : f32 to vector<1x128xf32>
    %110 = arith.select %103, %109, %108 : vector<1x128xi1>, vector<1x128xf32>
    %111 = vector.broadcast %78 : f32 to vector<1x128xf32>
    %112 = arith.select %101, %111, %110 : vector<1x128xi1>, vector<1x128xf32>
    %113 = vector.broadcast %69 : f32 to vector<1x128xf32>
    %114 = arith.select %99, %113, %112 : vector<1x128xi1>, vector<1x128xf32>
    %c0_47 = arith.constant 0 : index
    %c0_48 = arith.constant 0 : index
    %115 = vector.load %arg11[%c0_47, %c0_48] : memref<1x128xf32, #tpu.memory_space<vmem>>, vector<1x128xf32>
    tpu.vector_store %arg11[%c0_47, %c0_48], %114 {strides = array<i32>} : memref<1x128xf32, #tpu.memory_space<vmem>>, vector<1x128xf32>,
    return
  }
}

</mosaic_0001>

<bundles_post_ra>
// kernel: _dfgan_losses.1
= control target key start
LH: loop header
LB: loop body
LE: loop exit
PB: predicated region body
PF: predicated region fallthrough
CT: control target
= control target key end

     0   :  { %s1807_s0 = inlined_call_operand.vmem [shape: f32[8,32], index: 0, kind: input, shape index: {}]   ;;  %s1808_s1 = inlined_call_operand.vmem [shape: f32[8,32], index: 1, kind: input, shape index: {}]   ;;  %s1809_s2 = inlined_call_operand.vmem [shape: f32[8,768], index: 2, kind: input, shape index: {}]   ;;  %s1810_s3 = inlined_call_operand.vmem [shape: bf16[32,768], index: 3, kind: input, shape index: {}]   ;;  %s1811_s4 = inlined_call_operand.hbm [shape: bf16[32,768], index: 4, kind: input, shape index: {}]   ;;  %s1812_s5 = inlined_call_operand.vmem [shape: f32[1,768], index: 5, kind: input, shape index: {}]   ;;  %s1813_s6 = inlined_call_operand.vmem [shape: bf16[768,128], index: 6, kind: input, shape index: {}]   ;;  %s1814_s7 = inlined_call_operand.vmem [shape: f32[1,128], index: 7, kind: input, shape index: {}]   ;;  %s1815_s8 = inlined_call_operand.vmem [shape: f32[1,128], index: 8, kind: input, shape index: {}]   ;;  %s1816_s9 = inlined_call_operand.vmem [shape: f32[1,32], index: 9, kind: input, shape index: {}]   ;;  %s1817_s10 = inlined_call_operand.<no memory space> [shape: f32[1,1], index: 10, kind: input, shape index: {}]   ;;  %s1818_s11 = inlined_call_operand.vmem [shape: f32[1,128], index: 11, kind: output, shape index: {}]  }
   0x1   :  { %v16_v0 = vstv %s1817_s10 }
   0x2   :  { %17 = vst [vmem:[#allocation2] sm:$0x1] %v16_v0 }
   0x3   :  { %18 = vsyncpa [#allocation4], 0  ;;  %s1467_s19 = smov [#allocation3]   ;;  %s1443_s23 = scalar_lea.hbm %s1811_s4, 1536 }
   0x4   :  { %s32_s20 = sshll.u32 %s1467_s19, 4  ;;  %p1444_p0 = scmp.ne.s32.totalorder %s1811_s4, %s1443_s23  ;;  %s33_s20 = int_to_ptr.vmem [resolvable:$true] %s32_s20 }
   0x5   :  { %p1447_p1 = scmp.lt.u32.totalorder %s1443_s23, %s1811_s4 }
   0x7   :  { %p1449_p2 = pnand %p1447_p1, %p1444_p0 }
   0x9   :  { %1452 = shalt.err (!%p1449_p2)
}
   0xa   :  { %s1453_s10 = scalar_lea.vmem %s33_s20, 1536  ;;  %p1458_p4 = scmp.lt.s32.totalorder %s33_s20, %s33_s20 }
   0xb   :  { %p1454_p3 = scmp.ne.s32.totalorder %s33_s20, %s1453_s10  ;;  %p1459_p5 = scmp.lt.s32.totalorder %s1453_s10, %s1453_s10 }
   0xd   :  { %p1460_p6 = por %p1459_p5, %p1458_p4 }
   0xf   :  { %p1461_p7 = pnand %p1460_p6, %p1454_p3 }
  0x11   :  { %1464 = shalt.err (!%p1461_p7)
}
  0x12   :  { %s1468_s28 = smov 384   ;;  %s1469_s29 = smov 24  }
  0x13   :  { %38 = dma.hbm_to_vmem [thread:$0]  %s1811_s4, 1536, %s33_s20, [#allocation4], %s1468_s28, %s1468_s28, %s1469_s29  }
  0x14   :  { %1465 = dma.done.wait [#allocation4], 1536  }
  0x15   :  { %1466 = vsyncadd [#allocation4], 4294965760  ;;  %v1470_v1 = vmov 0   ;;  %v1347_v2 = vld [vmem:[#allocation3 + $0x4] ss:$24 sps:$4 sm:$0xff]   ;;  %vm143_vm0 = vcmask 261120   ;;  %v458_v63 = vlaneseq }
  0x16   :  { %179 = vmatprep.mubr.bf16.mxu1 %v1470_v1  ;;  %406 = vmatprep.mubr.bf16.mxu0 %v1470_v1  ;;  %v1349_v3 = vld [vmem:[#allocation3] ss:$24 sps:$4 sm:$0xff]   ;;  %v1350_v4 = vld [vmem:[#allocation3 + $0x34] ss:$24 sps:$4 sm:$0xff]   ;;  %v1352_v5 = vld [vmem:[#allocation3 + $0x30] ss:$24 sps:$4 sm:$0xff]  }
  0x17   :  { %147 = vmatprep.subr.bf16.mxu1 %v1347_v2  ;;  %v1549_v6 = vld [vmem:[%s1808_s1] sm:$0xff]  ;;  %v1362_v13 = vld [vmem:[%s1810_s3 + $0x3c] ss:$24 sps:$4 sm:$0xff]   ;;  %v1364_v14 = vld [vmem:[%s1810_s3 + $0x38] ss:$24 sps:$4 sm:$0xff]   ;;  %v1698_v0 = vshrl.u32 %v458_v63, 7 }
  0x18   :  { %148 = vmatpush1.bf16.msra.mxu1 %v1349_v3  ;;  %v1355_v7 = vld [vmem:[#allocation3 + $0xc] ss:$24 sps:$4 sm:$0xff]   ;;  %v70_v10 = vpack.c.bf16 %v1549_v6, %v1549_v6  ;;  %v1353_v11 = vld [vmem:[#allocation3 + $0x8] ss:$24 sps:$4 sm:$0xff]   ;;  %v1361_v12 = vld [vmem:[#allocation3 + $0x3c] ss:$24 sps:$4 sm:$0xff]  }
  0x19   :  { %149 = vmatprep.subr.bf16.mxu1 %v1350_v4  ;;  %v1356_v8 = vld [vmem:[%s1810_s3 + $0xc] ss:$24 sps:$4 sm:$0xff]   ;;  %v1358_v9 = vld [vmem:[%s1810_s3 + $0x8] ss:$24 sps:$4 sm:$0xff]   ;;  %v1359_v16 = vld [vmem:[#allocation3 + $0x38] ss:$24 sps:$4 sm:$0xff]  }
  0x1a   :  { %374 = vmatprep.subr.bf16.mxu0 %v1356_v8  ;;  %v56_v15 = vld [vmem:[%s1807_s0] sm:$0xff]  ;;  %v1367_v18 = vld [vmem:[#allocation3 + $0x14] ss:$24 sps:$4 sm:$0xff]   ;;  %v1365_v19 = vld [vmem:[#allocation3 + $0x10] ss:$24 sps:$4 sm:$0xff]   ;;  %v472_v8 = vsub.s32 3, %v1698_v0 }
  0x1b   :  { %375 = vmatpush1.bf16.msra.mxu0 %v1358_v9  ;;  %v57_v17 = vpack.c.bf16 %v56_v15, %v56_v15  ;;  %v1370_v20 = vld [vmem:[#allocation3 + $0x44] ss:$24 sps:$4 sm:$0xff]   ;;  %v1368_v21 = vld [vmem:[#allocation3 + $0x40] ss:$24 sps:$4 sm:$0xff]   ;;  %v1376_v24 = vld [vmem:[%s1810_s3 + $0x34] ss:$24 sps:$4 sm:$0xff]  }
  0x1c   :  { %150 = vmatpush1.bf16.msra.mxu1 %v1352_v5  ;;  %376 = vmatprep.subr.bf16.mxu0 %v1362_v13  ;;  %v1373_v22 = vld [vmem:[%s1810_s3 + $0x4] ss:$24 sps:$4 sm:$0xff]   ;;  %v1371_v23 = vld [vmem:[%s1810_s3] ss:$24 sps:$4 sm:$0xff]   ;;  %v1374_v25 = vld [vmem:[%s1810_s3 + $0x30] ss:$24 sps:$4 sm:$0xff]  }
  0x1d   :  { %188 = vmatprep.subr.bf16.mxu1 %v1355_v7  ;;  %v1379_v26 = vld [vmem:[%s1810_s3 + $0x14] ss:$24 sps:$4 sm:$0xff]   ;;  %v1377_v27 = vld [vmem:[%s1810_s3 + $0x10] ss:$24 sps:$4 sm:$0xff]   ;;  %v1382_v28 = vld [vmem:[%s1810_s3 + $0x44] ss:$24 sps:$4 sm:$0xff]  }
  0x1e   :  { %v1380_v29 = vld [vmem:[%s1810_s3 + $0x40] ss:$24 sps:$4 sm:$0xff]   ;;  %v1385_v32 = vld [vmem:[%s1813_s6 + $0xc8] sm:$0xff]   ;;  %v1387_v34 = vld [vmem:[%s1813_s6 + $0xd0] sm:$0xff]   ;;  %v468_v5 = vsub.s32 2, %v1698_v0  ;;  %vm530_vm1 = vcmask 1043456  }
  0x1f   :  { %1199 = vmatmul.mubr.msk.bf16.vlgmr.msra.gmra.mrb[0].mxu1 %vm143_vm0, %v70_v10  ;;  %377 = vmatpush1.bf16.msra.mxu0 %v1364_v14  ;;  %v1383_v30 = vld [vmem:[%s1813_s6 + $0xc0] sm:$0xff]   ;;  %v1386_v33 = vld [vmem:[%s1813_s6 + $0x88] sm:$0xff]   ;;  %v1388_v35 = vld [vmem:[%s1813_s6 + $0x90] sm:$0xff]   ;;  %vm1115_vm2 = vcmask 7168  }
  0x20   :  { %189 = vmatpush1.bf16.msra.mxu1 %v1353_v11  ;;  %220 = vmatprep.mubr.bf16.mxu1 %v1470_v1  ;;  %v1384_v31 = vld [vmem:[%s1813_s6 + $0x80] sm:$0xff]   ;;  %v1389_v36 = vld [vmem:[%s1813_s6 + $0xd8] sm:$0xff]   ;;  %v1395_v42 = vld [vmem:[%s1813_s6 + $0x48] sm:$0xff]  }
  0x21   :  { %190 = vmatprep.subr.bf16.mxu1 %v1361_v12  ;;  %v1390_v37 = vld [vmem:[%s1813_s6 + $0x98] sm:$0xff]   ;;  %v1391_v38 = vld [vmem:[%s1813_s6 + $0x40] sm:$0xff]   ;;  %v1396_v43 = vld [vmem:[%s1813_s6 + $0x8] sm:$0xff]  }
  0x22   :  { %1215 = vmatmul.mubr.msk.bf16.vlgmr.msra.gmra.mrb[0].mxu0 %vm143_vm0, %v57_v17  ;;  %v1392_v39 = vld [vmem:[%s1813_s6] sm:$0xff]   ;;  %1269 = vmatprep.subr.bf16.mxu0 %v1391_v38  ;;  %v1397_v44 = vld [vmem:[%s1813_s6 + $0xe8] sm:$0xff]   ;;  %v1399_v46 = vld [vmem:[%s1813_s6 + $0x50] sm:$0xff]  }
  0x23   :  { %v1393_v40 = vld [vmem:[%s1813_s6 + $0xe0] sm:$0xff]   ;;  %1270 = vmatpush3.bf16.msra.mxu0 %v1392_v39  ;;  %v1398_v45 = vld [vmem:[%s1813_s6 + $0xa8] sm:$0xff]   ;;  %v1400_v47 = vld [vmem:[%s1813_s6 + $0x10] sm:$0xff]  }
  0x24   :  { %191 = vmatpush1.bf16.msra.mxu1 %v1359_v16  ;;  %v1394_v41 = vld [vmem:[%s1813_s6 + $0xa0] sm:$0xff]   ;;  %1271 = vmatprep.subr.bf16.mxu0 %v1395_v42  ;;  %v1401_v48 = vld [vmem:[%s1813_s6 + $0xf0] sm:$0xff]   ;;  %v1403_v50 = vld [vmem:[%s1813_s6 + $0x58] sm:$0xff]  }
  0x25   :  { %229 = vmatprep.subr.bf16.mxu1 %v1367_v18  ;;  %v1402_v49 = vld [vmem:[%s1813_s6 + $0xb0] sm:$0xff]   ;;  %v1404_v51 = vld [vmem:[%s1813_s6 + $0x18] sm:$0xff]   ;;  %v1407_v54 = vld [vmem:[%s1813_s6 + $0x60] sm:$0xff]  }
  0x26   :  { %v1405_v52 = vld [vmem:[%s1813_s6 + $0xf8] sm:$0xff]   ;;  %v1408_v55 = vld [vmem:[%s1813_s6 + $0x20] sm:$0xff]   ;;  %v1409_v56 = vld [vmem:[%s1813_s6 + $0x68] sm:$0xff]  }
  0x27   :  { %1200 = vmatmul.mubr.msk.bf16.vlgmr.msra.gmra.mrb[4].mxu1 %vm143_vm0, %v70_v10  ;;  %1272 = vmatpush3.bf16.msra.mxu0 %v1396_v43  ;;  %v1406_v53 = vld [vmem:[%s1813_s6 + $0xb8] sm:$0xff]   ;;  %v1410_v57 = vld [vmem:[%s1813_s6 + $0x28] sm:$0xff]   ;;  %v1411_v58 = vld [vmem:[%s1813_s6 + $0x70] sm:$0xff]  }
  0x28   :  { %230 = vmatpush1.bf16.msra.mxu1 %v1365_v19  ;;  %261 = vmatprep.mubr.bf16.mxu1 %v1470_v1  ;;  %v1412_v59 = vld [vmem:[%s1813_s6 + $0x30] sm:$0xff]   ;;  %v1413_v60 = vld [vmem:[%s1813_s6 + $0x78] sm:$0xff]   ;;  %v1415_v62 = vld [vmem:[%s1813_s6 + $0x140] sm:$0xff]  }
  0x29   :  { %231 = vmatprep.subr.bf16.mxu1 %v1370_v20  ;;  %1273 = vmatprep.subr.bf16.mxu0 %v1399_v46  ;;  %v1414_v61 = vld [vmem:[%s1813_s6 + $0x38] sm:$0xff]   ;;  %v1704_v7 = vld [vmem:[%s1812_s5] sm:$0x3f] }
  0x2a   :  { %v469_v11 = vrot.slane %v1704_v7, %v468_v5  ;;  %v473_v14 = vrot.slane %v1704_v7, %v472_v8 }
  0x2b   :  { %1274 = vmatpush3.bf16.msra.mxu0 %v1400_v47 }
  0x2c   :  { %232 = vmatpush1.bf16.msra.mxu1 %v1368_v21  ;;  %1275 = vmatprep.subr.bf16.mxu0 %v1403_v50 }
  0x2d   :  { %333 = vmatprep.subr.bf16.mxu1 %v1373_v22 }
  0x2f   :  { %1201 = vmatmul.mubr.msk.bf16.vlgmr.msra.gmra.mrb[8].mxu1 %vm143_vm0, %v70_v10  ;;  %1276 = vmatpush3.bf16.msra.mxu0 %v1404_v51  ;;  %v480_v51 = vsub.s32 5, %v1698_v0 }
  0x30   :  { %334 = vmatpush1.bf16.msra.mxu1 %v1371_v23  ;;  %365 = vmatprep.mubr.bf16.mxu1 %v1470_v1 }
  0x31   :  { %335 = vmatprep.subr.bf16.mxu1 %v1376_v24  ;;  %1277 = vmatprep.subr.bf16.mxu0 %v1407_v54  ;;  %v509_v24 = vld [vmem:[%s1809_s2 + $0x18] sm:$0xff]  ;;  %v507_v54 = vld [vmem:[%s1809_s2 + $0x8] sm:$0xff] }
  0x33   :  { %1278 = vmatpush3.bf16.msra.mxu0 %v1408_v55 }
  0x34   :  { %336 = vmatpush1.bf16.msra.mxu1 %v1374_v25  ;;  %1279 = vmatprep.subr.bf16.mxu0 %v1409_v56 }
  0x35   :  { %415 = vmatprep.subr.bf16.mxu1 %v1379_v26  ;;  %v508_v26 = vld [vmem:[%s1809_s2 + $0x10] sm:$0xff] }
  0x37   :  { %1214 = vmatmul.mubr.msk.bf16.vlgmr.msra.gmra.mrb[12].mxu1 %vm143_vm0, %v57_v17  ;;  %1280 = vmatpush3.bf16.msra.mxu0 %v1410_v57  ;;  %v506_v57 = vld [vmem:[%s1809_s2] sm:$0xff] }
  0x38   :  { %416 = vmatpush1.bf16.msra.mxu1 %v1377_v27  ;;  %447 = vmatprep.mubr.bf16.mxu1 %v1470_v1 }
  0x39   :  { %417 = vmatprep.subr.bf16.mxu1 %v1382_v28  ;;  %1281 = vmatprep.subr.bf16.mxu0 %v1411_v58 }
  0x3b   :  { %1282 = vmatpush3.bf16.msra.mxu0 %v1412_v59 }
  0x3c   :  { %418 = vmatpush1.bf16.msra.mxu1 %v1380_v29  ;;  %1283 = vmatprep.subr.bf16.mxu0 %v1413_v60  ;;  %v460_v29 = vsub.s32 0, %v1698_v0  ;;  %v513_v60 = vpack.c.bf16 %v507_v54, %v507_v54 }
  0x3d   :  { %1291 = vmatprep.subr.bf16.mxu1 %v1383_v30  ;;  %v515_v30 = vpack.c.bf16 %v509_v24, %v509_v24 }
  0x3f   :  { %1216 = vmatmul.mubr.msk.bf16.vlgmr.msra.gmra.mrb[16].mxu1 %vm143_vm0, %v57_v17  ;;  %1284 = vmatpush3.bf16.msra.mxu0 %v1414_v61 }
  0x40   :  { %1292 = vmatpush3.bf16.msra.mxu1 %v1384_v31  ;;  %1313 = vmatprep.subr.bf16.mxu0 %v1415_v62  ;;  %v464_v31 = vsub.s32 1, %v1698_v0 }
  0x41   :  { %1293 = vmatprep.subr.bf16.mxu1 %v1385_v32  ;;  %v514_v32 = vpack.c.bf16 %v508_v26, %v508_v26 }
  0x42   :  { %v465_v39 = vrot.slane %v1704_v7, %v464_v31  ;;  %v510_v31 = vld [vmem:[%s1809_s2 + $0x20] sm:$0xff] }
  0x44   :  { %1294 = vmatpush3.bf16.msra.mxu1 %v1386_v33 }
  0x45   :  { %1295 = vmatprep.subr.bf16.mxu1 %v1387_v34  ;;  %v461_v34 = vrot.slane %v1704_v7, %v460_v29  ;;  %v1426_v29 = vld [vmem:[%s1813_s6 + $0x128] sm:$0xff]  }
  0x48   :  { %1296 = vmatpush3.bf16.msra.mxu1 %v1388_v35  ;;  %v527_v35 = vrot.slane %v515_v30, 4  ;;  %v1427_v30 = vld [vmem:[%s1813_s6 + $0x170] sm:$0xff]  }
  0x49   :  { %1297 = vmatprep.subr.bf16.mxu1 %v1389_v36 }
  0x4c   :  { %1298 = vmatpush3.bf16.msra.mxu1 %v1390_v37 }
  0x4d   :  { %1299 = vmatprep.subr.bf16.mxu1 %v1393_v40  ;;  %v526_v40 = vrot.slane %v514_v32, 4  ;;  %v1428_v32 = vld [vmem:[%s1813_s6 + $0x130] sm:$0xff]  }
  0x50   :  { %1300 = vmatpush3.bf16.msra.mxu1 %v1394_v41 }
  0x51   :  { %1301 = vmatprep.subr.bf16.mxu1 %v1397_v44 }
  0x54   :  { %1302 = vmatpush3.bf16.msra.mxu1 %v1398_v45 }
  0x55   :  { %1303 = vmatprep.subr.bf16.mxu1 %v1401_v48 }
  0x58   :  { %1304 = vmatpush3.bf16.msra.mxu1 %v1402_v49 }
  0x59   :  { %1305 = vmatprep.subr.bf16.mxu1 %v1405_v52 }
  0x5c   :  { %1306 = vmatpush3.bf16.msra.mxu1 %v1406_v53  ;;  %v481_v53 = vrot.slane %v1704_v7, %v480_v51 }
  0xf2   :  { %v181_v1 = vpop.f32.mrb[0].mxu1 }
  0xf3   :  { %v183_v2 = vpop.f32.mrb[1].mxu1 }
  0xf4   :  { %v185_v3 = vpop.f32.mrb[2].mxu1 }
  0xf5   :  { %v186_v4 = vpop.f32.mrb[3].mxu1  ;;  %v408_v9 = vpop.f32.mrb[0].mxu0  ;;  %v525_v3 = vrot.slane %v513_v60, 4 }
  0xf6   :  { %v410_v10 = vpop.f32.mrb[1].mxu0 }
  0xf7   :  { %v412_v12 = vpop.f32.mrb[2].mxu0 }
  0xf8   :  { %v413_v15 = vpop.f32.mrb[3].mxu0 }
  0xfa   :  { %v222_v13 = vpop.f32.mrb[4].mxu1 }
  0xfb   :  { %v409_v16 = vadd.f32 %v408_v9, %v222_v13  ;;  %v224_v17 = vpop.f32.mrb[5].mxu1  ;;  %v511_v9 = vld [vmem:[%s1809_s2 + $0x28] sm:$0xff] }
  0xfc   :  { %v411_v18 = vadd.f32 %v410_v10, %v224_v17  ;;  %v226_v19 = vpop.f32.mrb[6].mxu1  ;;  %v1417_v13 = vld [vmem:[%s1813_s6 + $0x148] sm:$0xff]   ;;  %v476_v17 = vsub.s32 4, %v1698_v0  ;;  %v1421_v0 = vld [vmem:[%s1813_s6 + $0x158] sm:$0xff]  }
  0xfd   :  { %v490_v20 = vadd.f32 %v469_v11, %v409_v16  ;;  %v227_v21 = vpop.f32.mrb[7].mxu1  ;;  %v1416_v11 = vld [vmem:[%s1813_s6 + $0x100] sm:$0xff]   ;;  %v1418_v16 = vld [vmem:[%s1813_s6 + $0x108] sm:$0xff]  }
  0xfe   :  { %v491_v22 = vadd.f32 %v473_v14, %v411_v18  ;;  %v517_v14 = vpack.c.bf16 %v511_v9, %v511_v9  ;;  %v1419_v18 = vld [vmem:[%s1813_s6 + $0x150] sm:$0xff]  }
  0xff   :  { %1431 = vtanh.f32 %v490_v20 }
 0x100   :  { %1433 = vtanh.f32 %v491_v22  ;;  %v529_v19 = vrot.slane %v517_v14, 4  ;;  %v1420_v22 = vld [vmem:[%s1813_s6 + $0x110] sm:$0xff]  }
 0x102   :  { %v263_v23 = vpop.f32.mrb[8].mxu1 }
 0x103   :  { %v265_v25 = vpop.f32.mrb[9].mxu1 }
 0x104   :  { %v267_v27 = vpop.f32.mrb[10].mxu1 }
 0x105   :  { %v268_v28 = vpop.f32.mrb[11].mxu1  ;;  %v1423_v27 = vld [vmem:[%s1813_s6 + $0x160] sm:$0xff]  }
 0x106   :  { %v1425_v28 = vld [vmem:[%s1813_s6 + $0x168] sm:$0xff]  }
 0x109   :  { %v1432_v33 = vpop.eup %1431 }
 0x10a   :  { %v1434_v36 = vpop.eup %1433  ;;  %v502_v37 = vpack.c.bf16 %v1432_v33, %v1432_v33  ;;  %v367_v38 = vpop.f32.mrb[12].mxu1  ;;  %v1429_v33 = vld [vmem:[%s1813_s6 + $0x178] sm:$0xff]  }
 0x10b   :  { %v503_v41 = vpack.c.bf16 %v1434_v36, %v1434_v36  ;;  %v368_v42 = vadd.f32 %v367_v38, %v181_v1  ;;  %v369_v43 = vpop.f32.mrb[13].mxu1  ;;  %v512_v1 = vpack.c.bf16 %v506_v57, %v506_v57  ;;  %v1430_v36 = vld [vmem:[%s1813_s6 + $0x138] sm:$0xff]  }
 0x10c   :  { %v370_v44 = vadd.f32 %v369_v43, %v183_v2  ;;  %v371_v45 = vpop.f32.mrb[14].mxu1  ;;  %v541_v50 = vsel %vm530_vm1, %v502_v37, %v526_v40 }
 0x10d   :  { %v488_v46 = vadd.f32 %v461_v34, %v368_v42  ;;  %v372_v47 = vpop.f32.mrb[15].mxu1  ;;  %v545_v48 = vsel %vm530_vm1, %v503_v41, %v527_v35  ;;  %v524_v8 = vrot.slane %v512_v1, 4  ;;  %v516_v34 = vpack.c.bf16 %v510_v31, %v510_v31 }
 0x10e   :  { %v489_v49 = vadd.f32 %v465_v39, %v370_v44  ;;  %1019 = vmatprep.mubr.bf16.mxu1 %v545_v48  ;;  %v1217_v47 = vld [vmem:[%s1814_s7] ss:$0 sm:$0xff] }
 0x10f   :  { %1435 = vtanh.f32 %v488_v46  ;;  %1020 = vmatmul.mubr.bf16.vlgmr.msra.gmra.mrb[20].mxu1 %v541_v50  ;;  %v528_v38 = vrot.slane %v516_v34, 4 }
 0x110   :  { %1437 = vtanh.f32 %v489_v49 }
 0x112   :  { %v449_v52 = vpop.f32.mrb[16].mxu1 }
 0x113   :  { %v450_v55 = vadd.f32 %v449_v52, %v263_v23  ;;  %v451_v56 = vpop.f32.mrb[17].mxu1  ;;  %v477_v23 = vrot.slane %v1704_v7, %v476_v17  ;;  %v1424_v7 = vld [vmem:[%s1813_s6 + $0x120] sm:$0xff]  }
 0x114   :  { %v452_v58 = vadd.f32 %v451_v56, %v265_v25  ;;  %v453_v59 = vpop.f32.mrb[18].mxu1  ;;  %v1422_v25 = vld [vmem:[%s1813_s6 + $0x118] sm:$0xff]  }
 0x115   :  { %v454_v61 = vpop.f32.mrb[19].mxu1  ;;  %v492_v26 = vadd.f32 %v477_v23, %v450_v55 }
 0x116   :  { %v493_v62 = vadd.f32 %v481_v53, %v452_v58 }
 0x118   :  { %1439 = vtanh.f32 %v493_v62 }
 0x119   :  { %v1436_v2 = vpop.eup %1435  ;;  %1441 = vtanh.f32 %v492_v26 }
 0x11a   :  { %v1438_v4 = vpop.eup %1437  ;;  %v500_v5 = vpack.c.bf16 %v1436_v2, %v1436_v2 }
 0x11b   :  { %v501_v10 = vpack.c.bf16 %v1438_v4, %v1438_v4  ;;  %v1267_v4 = vld [vmem:[%s1816_s9] ss:$0 sm:$0xff] }
 0x11c   :  { %v533_v15 = vsel %vm530_vm1, %v500_v5, %v524_v8  ;;  %v1266_v5 = vld [vmem:[%s1815_s8] ss:$0 sm:$0xff]  ;;  %v1076_v8 = vrot.slane %v1549_v6, 7 }
 0x11d   :  { %v537_v12 = vsel %vm530_vm1, %v501_v10, %v525_v3 }
 0x11e   :  { %978 = vmatprep.mubr.bf16.mxu0 %v537_v12  ;;  %v1109_v14 = vmul.f32 %v1267_v4, %v1076_v8 }
 0x11f   :  { %979 = vmatmul.mubr.bf16.vlgmr.msra.gmra.mrb[4].mxu0 %v533_v15 }
 0x120   :  { %1314 = vmatpush3.bf16.msra.mxu0 %v1416_v11  ;;  %v1092_v11 = vmul.f32 %v1267_v4, %v1549_v6  ;;  %v1110_v17 = vsel %vm143_vm0, %v1109_v14, 0.0 }
 0x121   :  { %1315 = vmatprep.subr.bf16.mxu0 %v1417_v13 }
 0x122   :  { %v1440_v20 = vpop.eup %1439 }
 0x123   :  { %v505_v21 = vpack.c.bf16 %v1440_v20, %v1440_v20  ;;  %v1442_v35 = vpop.eup %1441 }
 0x124   :  { %1316 = vmatpush3.bf16.msra.mxu0 %v1418_v16  ;;  %v504_v37 = vpack.c.bf16 %v1442_v35, %v1442_v35  ;;  %v1093_v16 = vsel %vm143_vm0, %v1092_v11, 0.0 }
 0x125   :  { %1317 = vmatprep.subr.bf16.mxu0 %v1419_v18  ;;  %v553_v24 = vsel %vm530_vm1, %v505_v21, %v529_v19  ;;  %v1268_v21 = vld [vmem:[#allocation2] ss:$0 sm:$0xff] }
 0x126   :  { %1060 = vmatprep.mubr.bf16.mxu0 %v553_v24  ;;  %v549_v39 = vsel %vm530_vm1, %v504_v37, %v528_v38 }
 0x128   :  { %1318 = vmatpush3.bf16.msra.mxu0 %v1420_v22 }
 0x129   :  { %1319 = vmatprep.subr.bf16.mxu0 %v1421_v0 }
 0x12c   :  { %1320 = vmatpush3.bf16.msra.mxu0 %v1422_v25 }
 0x12d   :  { %1321 = vmatprep.subr.bf16.mxu0 %v1423_v27 }
 0x130   :  { %1322 = vmatpush3.bf16.msra.mxu0 %v1424_v7 }
 0x131   :  { %1323 = vmatprep.subr.bf16.mxu0 %v1425_v28 }
 0x134   :  { %1324 = vmatpush3.bf16.msra.mxu0 %v1426_v29 }
 0x135   :  { %1325 = vmatprep.subr.bf16.mxu0 %v1427_v30 }
 0x138   :  { %1326 = vmatpush3.bf16.msra.mxu0 %v1428_v32 }
 0x139   :  { %1327 = vmatprep.subr.bf16.mxu0 %v1429_v33 }
 0x13c   :  { %1328 = vmatpush3.bf16.msra.mxu0 %v1430_v36 }
 0x13f   :  { %1061 = vmatmul.mubr.bf16.vlgmr.msra.gmra.mrb[8].mxu0 %v549_v39 }
 0x1e2   :  { %v1307_v40 = vpop.f32.mrb[20].mxu1 }
 0x1e3   :  { %v1308_v41 = vpop.f32.mrb[21].mxu1 }
 0x1e4   :  { %v1309_v42 = vadd.f32 %v1308_v41, %v1307_v40  ;;  %v1310_v43 = vpop.f32.mrb[22].mxu1 }
 0x1e5   :  { %v1311_v44 = vpop.f32.mrb[23].mxu1 }
 0x1e6   :  { %v1312_v45 = vadd.f32 %v1311_v44, %v1310_v43 }
 0x1f2   :  { %v1285_v46 = vpop.f32.mrb[4].mxu0 }
 0x1f3   :  { %v1286_v48 = vpop.f32.mrb[5].mxu0 }
 0x1f4   :  { %v1287_v49 = vadd.f32 %v1286_v48, %v1285_v46  ;;  %v1288_v50 = vpop.f32.mrb[6].mxu0 }
 0x1f5   :  { %v1289_v51 = vpop.f32.mrb[7].mxu0 }
 0x1f6   :  { %v981_v52 = vadd.f32 %v1287_v49, %v1217_v47  ;;  %v1290_v53 = vadd.f32 %v1289_v51, %v1288_v50 }
 0x1f8   :  { %v984_v54 = vadd.f32 %v1290_v53, %v1217_v47  ;;  %v1022_v55 = vadd.f32 %v1309_v42, %v981_v52 }
 0x1fa   :  { %v1025_v56 = vadd.f32 %v1312_v45, %v984_v54 }
 0x212   :  { %v1329_v57 = vpop.f32.mrb[8].mxu0 }
 0x213   :  { %v1330_v58 = vpop.f32.mrb[9].mxu0 }
 0x214   :  { %v1331_v59 = vadd.f32 %v1330_v58, %v1329_v57  ;;  %v1332_v60 = vpop.f32.mrb[10].mxu0 }
 0x215   :  { %v1333_v61 = vpop.f32.mrb[11].mxu0 }
 0x216   :  { %v1063_v62 = vadd.f32 %v1331_v59, %v1022_v55  ;;  %v1334_v1 = vadd.f32 %v1333_v61, %v1332_v60 }
 0x218   :  { %v1066_v2 = vadd.f32 %v1334_v1, %v1025_v56  ;;  %v1069_v3 = vmul.f32 0.2, %v1063_v62 }
 0x21a   :  { %v1071_v9 = vmax.f32 %v1063_v62, %v1069_v3  ;;  %v1070_v10 = vmul.f32 0.2, %v1066_v2 }
 0x21c   :  { %v1083_v12 = vmul.f32 %v1266_v5, %v1071_v9  ;;  %v1072_v13 = vmax.f32 %v1066_v2, %v1070_v10  ;;  %v1168_v2 = vand.u32 127, %v458_v63 }
 0x21e   :  { %1084 = vadd.xlane.f32.xlu0 %v1083_v12  ;;  %v1104_v15 = vmul.f32 %v1266_v5, %v1072_v13  ;;  %vm1172_vm3 = vcmp.eq.s32.totalorder %v1168_v2, 3  ;;  %vm1171_vm4 = vcmp.eq.s32.totalorder %v1168_v2, 2  ;;  %vm1170_vm5 = vcmp.eq.s32.totalorder %v1168_v2, 1 }
 0x21f   :  { %vm1169_vm6 = vcmp.eq.s32.totalorder %v1168_v2, 0 }
 0x220   :  { %1105 = vadd.xlane.f32.xlu1 %v1104_v15 }
 0x222   :  { %1094 = vadd.xlane.f32.xlu0 %v1093_v16 }
 0x224   :  { %1111 = vadd.xlane.f32.xlu1 %v1110_v17 }
 0x2ab   :  { %v1085_v18 = vpop.xlane.xlu0 %1084 }
 0x2ad   :  { %v1106_v19 = vpop.xlane.xlu1 %1105 }
 0x2af   :  { %v1095_v20 = vpop.xlane.xlu0 %1094 }
 0x2b0   :  { %v1096_v22 = vadd.f32 %v1095_v20, %v1085_v18  ;;  %v1107_v23 = vadd.f32 %v1106_v19, %v1095_v20 }
 0x2b1   :  { %v1112_v24 = vpop.xlane.xlu1 %1111 }
 0x2b2   :  { %v1113_v6 = vadd.f32 %v1112_v24, %v1106_v19  ;;  %v1103_v0 = vadd.f32 %v1268_v21, %v1096_v22  ;;  %v1108_v25 = vadd.f32 %v1268_v21, %v1107_v23 }
 0x2b4   :  { %v1114_v26 = vadd.f32 %v1268_v21, %v1113_v6  ;;  %v1116_v27 = vsel %vm1115_vm2, %v1103_v0, 0.0  ;;  %v1128_v7 = vadd.f32 1.0, %v1103_v0  ;;  %v1141_v28 = vsub.f32 1.0, %v1108_v25 }
 0x2b5   :  { %1117 = vadd.xlane.f32.xlu0 %v1116_v27 }
 0x2b6   :  { %v1129_v29 = vmax.f32 %v1128_v7, 0.0  ;;  %v1142_v30 = vmax.f32 %v1141_v28, 0.0  ;;  %v1154_v31 = vadd.f32 1.0, %v1114_v26 }
 0x2b8   :  { %v1130_v32 = vsel %vm1115_vm2, %v1129_v29, 0.0  ;;  %v1143_v33 = vsel %vm1115_vm2, %v1142_v30, 0.0  ;;  %v1155_v34 = vmax.f32 %v1154_v31, 0.0 }
 0x2b9   :  { %1131 = vadd.xlane.f32.xlu1 %v1130_v32  ;;  %1144 = vadd.xlane.f32.xlu0 %v1143_v33 }
 0x2ba   :  { %v1156_v35 = vsel %vm1115_vm2, %v1155_v34, 0.0 }
 0x2bd   :  { %1157 = vadd.xlane.f32.xlu1 %v1156_v35 }
 0x342   :  { %v1118_v36 = vpop.xlane.xlu0 %1117 }
 0x343   :  { %v1119_v37 = vrot.slane %v1118_v36, 4 }
 0x345   :  { %v1120_v38 = vadd.f32 %v1119_v37, %v1118_v36 }
 0x346   :  { %v1132_v39 = vpop.xlane.xlu1 %1131  ;;  %v1145_v40 = vpop.xlane.xlu0 %1144 }
 0x347   :  { %v1121_v41 = vrot.slane %v1120_v38, 2  ;;  %v1133_v42 = vrot.slane %v1132_v39, 4  ;;  %v1146_v43 = vrot.slane %v1145_v40, 4 }
 0x349   :  { %v1134_v44 = vadd.f32 %v1133_v42, %v1132_v39  ;;  %v1147_v45 = vadd.f32 %v1146_v43, %v1145_v40  ;;  %v1122_v46 = vadd.f32 %v1121_v41, %v1120_v38 }
 0x34a   :  { %v1158_v47 = vpop.xlane.xlu1 %1157 }
 0x34b   :  { %v1135_v48 = vrot.slane %v1134_v44, 2  ;;  %v1148_v49 = vrot.slane %v1147_v45, 2  ;;  %v1159_v50 = vrot.slane %v1158_v47, 4  ;;  %v1123_v51 = vrot.slane %v1122_v46, 1 }
 0x34d   :  { %v1149_v52 = vadd.f32 %v1148_v49, %v1147_v45  ;;  %v1160_v53 = vadd.f32 %v1159_v50, %v1158_v47  ;;  %v1124_v54 = vadd.f32 %v1123_v51, %v1122_v46  ;;  %v1136_v55 = vadd.f32 %v1135_v48, %v1134_v44 }
 0x34f   :  { %v1161_v56 = vrot.slane %v1160_v53, 2  ;;  %1335 = vpush %v1124_v54  ;;  %v1137_v57 = vrot.slane %v1136_v55, 1  ;;  %v1150_v58 = vrot.slane %v1149_v52, 1 }
 0x351   :  { %v1162_v59 = vadd.f32 %v1161_v56, %v1160_v53  ;;  %v1138_v60 = vadd.f32 %v1137_v57, %v1136_v55  ;;  %v1151_v61 = vadd.f32 %v1150_v58, %v1149_v52 }
 0x353   :  { %1337 = vpush %v1138_v60  ;;  %v1163_v62 = vrot.slane %v1162_v59, 1 }
 0x354   :  { %1339 = vpush %v1151_v61 }
 0x355   :  { %v1164_v1 = vadd.f32 %v1163_v62, %v1162_v59 }
 0x357   :  { %1341 = vpush %v1164_v1 }
 0x380   :  { %s1336_s8 = spop %1335 }
 0x381   :  { %s1126_s29 = ssub.f32 0.0, %s1336_s8 }
 0x383   :  { %s1127_s14 = smul.f32 0.125, %s1126_s29 }
 0x384   :  { %s1338_s9 = spop %1337 }
 0x385   :  { %s1340_s28 = spop %1339  ;;  %s1140_s30 = smul.f32 0.125, %s1338_s9  ;;  %v1179_v10 = vstv %s1127_s14 }
 0x386   :  { %s1153_s12 = smul.f32 0.125, %s1340_s28 }
 0x387   :  { %v1177_v8 = vstv %s1140_s30 }
 0x388   :  { %s1342_s13 = spop %1341  ;;  %v1175_v4 = vstv %s1153_s12 }
 0x389   :  { %s1166_s5 = smul.f32 0.125, %s1342_s13 }
 0x38b   :  { %v1173_v3 = vstv %s1166_s5 }
 0x38c   :  { %v1174_v5 = vsel %vm1172_vm3, %v1173_v3, 0.0 }
 0x38d   :  { %v1176_v9 = vsel %vm1171_vm4, %v1175_v4, %v1174_v5 }
 0x38e   :  { %v1178_v11 = vsel %vm1170_vm5, %v1177_v8, %v1176_v9 }
 0x38f   :  { %v1180_v12 = vsel %vm1169_vm6, %v1179_v10, %v1178_v11 }
 0x390   :  { %1181 = vst [vmem:[%s1818_s11] sm:$0x1] %v1180_v12 }
 0x391   :  { %1186 = vsyncpa [#allocation4], 1 }

</bundles_post_ra>
